<compile_context>
chip_gen: v7x
topology: tpu7x:2x2x1
jax: 0.10.0
libtpu: 0.0.40
codegen_flags: <defaults>
</compile_context>

<pallas_src>
import math

import jax
import jax.numpy as jnp
from jax.experimental import pallas as pl
from jax.experimental.pallas import tpu as pltpu


# ---------------------------------------------------------------------------
# helpers
# ---------------------------------------------------------------------------
def _round_up(x, m):
    return pl.cdiv(x, m) * m


def _vmem_capacity_bytes():
    try:
        info = pltpu.get_tpu_info()
        cap = getattr(info, "vmem_capacity_bytes", None)
        if cap:
            return int(cap)
    except Exception:
        pass
    return 64 << 20  # conservative default: v7x per-TensorCore VMEM


def _pick_tm(M, tm_target):
    """M tile: multiple of 16 (bf16 sublane packing). For medium/large M we
    guarantee >= 2 tiles so the 'parallel' axis can shard across 2 TCs (v7x)."""
    tm_target = max(16, _round_up(tm_target, 16))
    Mp16 = _round_up(M, 16)
    if Mp16 < 512:
        return Mp16                                   # small: single tile
    if Mp16 < 2 * tm_target:
        return _round_up(pl.cdiv(Mp16, 2), 16)        # exactly 2 tiles
    return tm_target


def _resident_fp(tm, H, Ip, bpe_in, bpe_out):
    """Conservative VMEM footprint of the weight-resident path (bytes)."""
    return (2 * tm * H * bpe_in          # x tile, double-buffered
            + 2 * tm * H * bpe_out       # out tile, double-buffered
            + 2 * (2 * H * Ip * 2)       # W1t + W2t bf16 (count 2 buffers)
            + 2 * (Ip + H) * 4           # biases
            + tm * Ip * (4 + 2))         # f32 intermediate + bf16 copy


def _ktiled_fp(tm, tk, H, bpe_in, bpe_out):
    """Conservative VMEM footprint of the k-tiled streaming path (bytes)."""
    return (2 * tm * H * bpe_in          # x tile
            + 2 * tm * H * bpe_out       # out tile
            + tm * H * 4                 # f32 accumulator scratch
            + 2 * (2 * H * tk * 2)       # W1t/W2t chunks, double-buffered bf16
            + 2 * (tk + H) * 4           # bias chunks
            + tm * tk * (4 + 2))         # intermediate chunk


def _prepare_params(w1t, b1, w2t, b2, Ip):
    """One-time weight prep (bf16 cast + zero-pad I). In a real model cache
    this per layer; padded I columns contribute exactly zero (GELU(0)=0 and
    padded W2 rows are zero)."""
    H, I = w1t.shape
    w1p = w1t.astype(jnp.bfloat16)
    w2p = w2t.astype(jnp.bfloat16)
    b1p = b1.reshape(1, I).astype(jnp.float32)
    b2p = b2.reshape(1, H).astype(jnp.float32)
    if Ip != I:
        w1p = jnp.pad(w1p, ((0, 0), (0, Ip - I)))
        b1p = jnp.pad(b1p, ((0, 0), (0, Ip - I)))
        w2p = jnp.pad(w2p, ((0, Ip - I), (0, 0)))
    return w1p, b1p, w2p, b2p


# ---------------------------------------------------------------------------
# kernels
# ---------------------------------------------------------------------------
def _ffn_resident_kernel(x_ref, w1_ref, b1_ref, w2_ref, b2_ref, o_ref):
    # x_ref: (tm, H) native dtype; w1_ref: (H, Ip) bf16; b1_ref: (1, Ip) f32;
    # w2_ref: (Ip, H) bf16; b2_ref: (1, H) f32; o_ref: (tm, H).
    x = x_ref[...].astype(jnp.bfloat16)
    h = jnp.dot(x, w1_ref[...], preferred_element_type=jnp.float32)
    h = h + b1_ref[...]
    # tanh-approx GELU: transcendental lands on the EUP slot (co-issues).
    h = jax.nn.gelu(h, approximate=True)
    # dropout: identity (eval mode)
    out = jnp.dot(h.astype(jnp.bfloat16), w2_ref[...],
                  preferred_element_type=jnp.float32)
    o_ref[...] = (out + b2_ref[...]).astype(o_ref.dtype)


def _ffn_ktiled_kernel(x_ref, w1_ref, b1_ref, w2_ref, b2_ref, o_ref, acc_ref):
    # x_ref: (tm, H); w1_ref: (H, tk) bf16; b1_ref: (1, tk) f32;
    # w2_ref: (tk, H) bf16; b2_ref: (1, H) f32; acc_ref: (tm, H) f32 scratch.
    k = pl.program_id(1)

    @pl.when(k == 0)
    def _():
        acc_ref[...] = jnp.zeros_like(acc_ref)

    x = x_ref[...].astype(jnp.bfloat16)
    h = jnp.dot(x, w1_ref[...], preferred_element_type=jnp.float32)
    h = h + b1_ref[...]
    h = jax.nn.gelu(h, approximate=True)
    # dropout: identity (eval mode)
    acc_ref[...] += jnp.dot(h.astype(jnp.bfloat16), w2_ref[...],
                            preferred_element_type=jnp.float32)

    @pl.when(k == pl.num_programs(1) - 1)
    def _():
        o_ref[...] = (acc_ref[...] + b2_ref[...]).astype(o_ref.dtype)


# ---------------------------------------------------------------------------
# wrapper
# ---------------------------------------------------------------------------
def feed_forward(x, w1t, b1, w2t, b2, *, tm=512, tk=1024, force_ktiled=False):
    """BERT FFN forward. x: [B, S, H] (any float dtype); w1t: [H, I];
    b1: [I]; w2t: [I, H]; b2: [H]. Returns [B, S, H] in x.dtype."""
    B, S, H = x.shape
    I = w1t.shape[1]
    M = B * S
    out_dtype = x.dtype
    bpe_in = jnp.dtype(x.dtype).itemsize
    bpe_out = jnp.dtype(out_dtype).itemsize

    vmem_cap = _vmem_capacity_bytes()
    budget = int(0.7 * vmem_cap)

    tm = _pick_tm(M, tm)

    # ---- path selection: weights resident (no k axis) vs k-tiled streaming --
    Ip_res = max(128, _round_up(I, 128))
    use_resident = (not force_ktiled
                    and _resident_fp(tm, H, Ip_res, bpe_in, bpe_out) <= budget)
    if (not force_ktiled) and (not use_resident):
        # try a smaller M tile before falling back to weight streaming
        tm_small = max(16, min(tm, 256))
        if _resident_fp(tm_small, H, Ip_res, bpe_in, bpe_out) <= budget:
            tm, use_resident = tm_small, True

    if use_resident:
        Ip = Ip_res
        footprint = _resident_fp(tm, H, Ip, bpe_in, bpe_out)
    else:
        tk = max(256, min(_round_up(tk, 256), _round_up(I, 256)))
        while tk > 256 and _ktiled_fp(tm, tk, H, bpe_in, bpe_out) > budget:
            tk -= 256
        while tm > 16 and _ktiled_fp(tm, tk, H, bpe_in, bpe_out) > budget:
            tm = max(16, _round_up(tm // 2, 16))
        Ip = _round_up(I, tk)
        footprint = _ktiled_fp(tm, tk, H, bpe_in, bpe_out)

    vmem_limit = int(min(0.9 * vmem_cap, max(32 << 20, int(1.25 * footprint))))

    # ---- operand prep (weights: one-time per model in a real layer stack) ---
    w1p, b1p, w2p, b2p = _prepare_params(w1t, b1, w2t, b2, Ip)
    Mp = _round_up(M, tm)
    x2 = x.reshape(M, H)
    if Mp != M:
        x2 = jnp.pad(x2, ((0, Mp - M), (0, 0)))

    grid_m = Mp // tm

    if use_resident:
        cost = pl.CostEstimate(
            flops=4 * Mp * H * Ip,
            transcendentals=Mp * Ip,
            bytes_accessed=(Mp * H * bpe_in + Mp * H * bpe_out
                            + 2 * H * Ip * 2 + (Ip + H) * 4),
        )
        out2 = pl.pallas_call(
            _ffn_resident_kernel,
            out_shape=jax.ShapeDtypeStruct((Mp, H), out_dtype),
            grid_spec=pltpu.PrefetchScalarGridSpec(
                num_scalar_prefetch=0,
                grid=(grid_m,),
                in_specs=[
                    pl.BlockSpec((tm, H), lambda i: (i, 0)),   # x tile
                    pl.BlockSpec((H, Ip), lambda i: (0, 0)),   # W1t (resident)
                    pl.BlockSpec((1, Ip), lambda i: (0, 0)),   # b1
                    pl.BlockSpec((Ip, H), lambda i: (0, 0)),   # W2t (resident)
                    pl.BlockSpec((1, H), lambda i: (0, 0)),    # b2
                ],
                out_specs=pl.BlockSpec((tm, H), lambda i: (i, 0)),
            ),
            compiler_params=pltpu.CompilerParams(
                dimension_semantics=("parallel",),
                vmem_limit_bytes=vmem_limit),
            cost_estimate=cost,
        )(x2, w1p, b1p, w2p, b2p)
    else:
        grid_k = Ip // tk
        cost = pl.CostEstimate(
            flops=4 * Mp * H * Ip,
            transcendentals=Mp * Ip,
            bytes_accessed=(Mp * H * bpe_in + Mp * H * bpe_out
                            + grid_m * (2 * H * Ip * 2 + Ip * 4) + H * 4),
        )
        out2 = pl.pallas_call(
            _ffn_ktiled_kernel,
            out_shape=jax.ShapeDtypeStruct((Mp, H), out_dtype),
            grid_spec=pltpu.PrefetchScalarGridSpec(
                num_scalar_prefetch=0,
                grid=(grid_m, grid_k),
                in_specs=[
                    pl.BlockSpec((tm, H), lambda i, k: (i, 0)),  # x (resident over k)
                    pl.BlockSpec((H, tk), lambda i, k: (0, k)),  # W1t chunk
                    pl.BlockSpec((1, tk), lambda i, k: (0, k)),  # b1 chunk
                    pl.BlockSpec((tk, H), lambda i, k: (k, 0)),  # W2t chunk
                    pl.BlockSpec((1, H), lambda i, k: (0, 0)),   # b2
                ],
                out_specs=pl.BlockSpec((tm, H), lambda i, k: (i, 0)),
                scratch_shapes=[pltpu.VMEM((tm, H), jnp.float32)],
            ),
            compiler_params=pltpu.CompilerParams(
                dimension_semantics=("parallel", "arbitrary"),
                vmem_limit_bytes=vmem_limit),
            cost_estimate=cost,
        )(x2, w1p, b1p, w2p, b2p)

    return out2[:M].reshape(B, S, H)


# ---------------------------------------------------------------------------
# demo / correctness check
# ---------------------------------------------------------------------------
if __name__ == "__main__":
    # Small BertConfig-like sizes (TPU-tile friendly).
    B, S = 2, 8
    hidden_size = 128
    intermediate_size = 512

    key = jax.random.PRNGKey(0)
    kx, k1, k2, k3, k4 = jax.random.split(key, 5)

    x = jax.random.normal(kx, (B, S, hidden_size), dtype=jnp.float32)

    # PyTorch nn.Linear init: U(-1/sqrt(fan_in), 1/sqrt(fan_in))
    bound1 = 1.0 / math.sqrt(hidden_size)
    w1 = jax.random.uniform(k1, (intermediate_size, hidden_size),
                            minval=-bound1, maxval=bound1, dtype=jnp.float32)
    b1 = jax.random.uniform(k2, (intermediate_size,),
                            minval=-bound1, maxval=bound1, dtype=jnp.float32)
    bound2 = 1.0 / math.sqrt(intermediate_size)
    w2 = jax.random.uniform(k3, (hidden_size, intermediate_size),
                            minval=-bound2, maxval=bound2, dtype=jnp.float32)
    b2 = jax.random.uniform(k4, (hidden_size,),
                            minval=-bound2, maxval=bound2, dtype=jnp.float32)

    # pre-transpose weights for row-major matmul in-kernel
    w1t = w1.T  # (H, I)
    w2t = w2.T  # (I, H)

    # pure-JAX f32 reference (exact-erf GELU, matching nn.GELU default)
    h_ref = x.reshape(-1, hidden_size) @ w1.T + b1
    h_ref = 0.5 * h_ref * (1.0 + jax.lax.erf(h_ref / math.sqrt(2.0)))
    ref = (h_ref @ w2.T + b2).reshape(B, S, hidden_size)

    # primary (weight-resident) path
    out = jax.block_until_ready(feed_forward(x, w1t, b1, w2t, b2))
    assert jnp.allclose(out, ref, atol=3e-2, rtol=3e-2), (
        float(jnp.max(jnp.abs(out - ref))))

    # fallback (k-tiled streaming) path
    out_kt = jax.block_until_ready(
        feed_forward(x, w1t, b1, w2t, b2, force_ktiled=True))
    assert jnp.allclose(out_kt, ref, atol=3e-2, rtol=3e-2), (
        float(jnp.max(jnp.abs(out_kt - ref))))

    print("KERNEL_OK")
</pallas_src>

<mosaic_0001>
module attributes {stable_mosaic.version = 11 : i64} {
  func.func @_ffn_resident_kernel(%arg0: i32, %arg1: memref<16x128xf32, #tpu.memory_space<vmem>>, %arg2: memref<128x512xbf16, #tpu.memory_space<vmem>>, %arg3: memref<1x512xf32, #tpu.memory_space<vmem>>, %arg4: memref<512x128xbf16, #tpu.memory_space<vmem>>, %arg5: memref<1x128xf32, #tpu.memory_space<vmem>>, %arg6: memref<16x128xf32, #tpu.memory_space<vmem>>) attributes {dimension_semantics = [#tpu.dimension_semantics<parallel>], iteration_bounds = array<i64: 1>, scalar_prefetch = 0 : i64, scratch_operands = 0 : i64, tpu.core_type = #tpu.core_type<tc>, window_params = [{transform_indices = @transform_0, window_bounds = array<i64: 16, 128>}, {pipeline_mode = #tpu.pipeline_mode<synchronous>, transform_indices = @transform_1, window_bounds = array<i64: 128, 512>}, {pipeline_mode = #tpu.pipeline_mode<synchronous>, transform_indices = @transform_2, window_bounds = array<i64: 1, 512>}, {pipeline_mode = #tpu.pipeline_mode<synchronous>, transform_indices = @transform_3, window_bounds = array<i64: 512, 128>}, {pipeline_mode = #tpu.pipeline_mode<synchronous>, transform_indices = @transform_4, window_bounds = array<i64: 1, 128>}, {transform_indices = @transform_5, window_bounds = array<i64: 16, 128>}]} {
    %c0 = arith.constant 0 : index
    %c0_0 = arith.constant 0 : index
    %0 = vector.load %arg1[%c0, %c0_0] : memref<16x128xf32, #tpu.memory_space<vmem>>, vector<16x128xf32>
    %1 = arith.truncf %0 : vector<16x128xf32> to vector<16x128xbf16>
    %c0_1 = arith.constant 0 : index
    %c0_2 = arith.constant 0 : index
    %2 = vector.load %arg2[%c0_1, %c0_2] : memref<128x512xbf16, #tpu.memory_space<vmem>>, vector<128x512xbf16>
    %cst = arith.constant dense<0.000000e+00> : vector<16x512xf32>
    %3 = tpu.matmul %1, %2, %cst {dimension_numbers = #tpu.dot_dimension_numbers<[1], [0], [0], [1], [0, 0, 1, 1], [], []>} : vector<16x128xbf16>, vector<128x512xbf16>, vector<16x512xf32> -> vector<16x512xf32>
    %c0_3 = arith.constant 0 : index
    %c0_4 = arith.constant 0 : index
    %4 = vector.load %arg3[%c0_3, %c0_4] : memref<1x512xf32, #tpu.memory_space<vmem>>, vector<1x512xf32>
    %5 = vector.broadcast %4 : vector<1x512xf32> to vector<16x512xf32>
    %6 = arith.addf %3, %5 : vector<16x512xf32>
    %7 = arith.mulf %6, %6 : vector<16x512xf32>
    %8 = arith.mulf %6, %7 : vector<16x512xf32>
    %cst_5 = arith.constant 4.471500e-02 : f32
    %9 = vector.broadcast %cst_5 : f32 to vector<16x512xf32>
    %10 = arith.mulf %9, %8 : vector<16x512xf32>
    %11 = arith.addf %6, %10 : vector<16x512xf32>
    %cst_6 = arith.constant 0.797884583 : f32
    %12 = vector.broadcast %cst_6 : f32 to vector<16x512xf32>
    %13 = arith.mulf %12, %11 : vector<16x512xf32>
    %14 = math.tanh %13 : vector<16x512xf32>
    %cst_7 = arith.constant 1.000000e+00 : f32
    %15 = vector.broadcast %cst_7 : f32 to vector<16x512xf32>
    %16 = arith.addf %15, %14 : vector<16x512xf32>
    %cst_8 = arith.constant 5.000000e-01 : f32
    %17 = vector.broadcast %cst_8 : f32 to vector<16x512xf32>
    %18 = arith.mulf %17, %16 : vector<16x512xf32>
    %19 = arith.mulf %6, %18 : vector<16x512xf32>
    %20 = arith.truncf %19 : vector<16x512xf32> to vector<16x512xbf16>
    %c0_9 = arith.constant 0 : index
    %c0_10 = arith.constant 0 : index
    %21 = vector.load %arg4[%c0_9, %c0_10] : memref<512x128xbf16, #tpu.memory_space<vmem>>, vector<512x128xbf16>
    %cst_11 = arith.constant dense<0.000000e+00> : vector<16x128xf32>
    %22 = tpu.matmul %20, %21, %cst_11 {dimension_numbers = #tpu.dot_dimension_numbers<[1], [0], [0], [1], [0, 0, 1, 1], [], []>} : vector<16x512xbf16>, vector<512x128xbf16>, vector<16x128xf32> -> vector<16x128xf32>
    %c0_12 = arith.constant 0 : index
    %c0_13 = arith.constant 0 : index
    %23 = vector.load %arg5[%c0_12, %c0_13] : memref<1x128xf32, #tpu.memory_space<vmem>>, vector<1x128xf32>
    %24 = vector.broadcast %23 : vector<1x128xf32> to vector<16x128xf32>
    %25 = arith.addf %22, %24 : vector<16x128xf32>
    %c0_14 = arith.constant 0 : index
    %c0_15 = arith.constant 0 : index
    %26 = vector.load %arg6[%c0_14, %c0_15] : memref<16x128xf32, #tpu.memory_space<vmem>>, vector<16x128xf32>
    tpu.vector_store %arg6[%c0_14, %c0_15], %25 {strides = array<i32>} : memref<16x128xf32, #tpu.memory_space<vmem>>, vector<16x128xf32>,
    return
  }
  func.func @transform_0(%arg0: i32) -> (i32, i32) {
    %c0_i32 = arith.constant 0 : i32
    %c0_i32_0 = arith.constant 0 : i32
    return %arg0, %c0_i32 : i32, i32
  }
  func.func @transform_1(%arg0: i32) -> (i32, i32) {
    %c0_i32 = arith.constant 0 : i32
    %c0_i32_0 = arith.constant 0 : i32
    %c0_i32_1 = arith.constant 0 : i32
    return %c0_i32, %c0_i32_0 : i32, i32
  }
  func.func @transform_2(%arg0: i32) -> (i32, i32) {
    %c0_i32 = arith.constant 0 : i32
    %c0_i32_0 = arith.constant 0 : i32
    %c0_i32_1 = arith.constant 0 : i32
    return %c0_i32, %c0_i32_0 : i32, i32
  }
  func.func @transform_3(%arg0: i32) -> (i32, i32) {
    %c0_i32 = arith.constant 0 : i32
    %c0_i32_0 = arith.constant 0 : i32
    %c0_i32_1 = arith.constant 0 : i32
    return %c0_i32, %c0_i32_0 : i32, i32
  }
  func.func @transform_4(%arg0: i32) -> (i32, i32) {
    %c0_i32 = arith.constant 0 : i32
    %c0_i32_0 = arith.constant 0 : i32
    %c0_i32_1 = arith.constant 0 : i32
    return %c0_i32, %c0_i32_0 : i32, i32
  }
  func.func @transform_5(%arg0: i32) -> (i32, i32) {
    %c0_i32 = arith.constant 0 : i32
    %c0_i32_0 = arith.constant 0 : i32
    return %arg0, %c0_i32 : i32, i32
  }
}

</mosaic_0001>

<bundles_post_ra>
// kernel: tpu_custom_call.1
= control target key start
LH: loop header
LB: loop body
LE: loop exit
PB: predicated region body
PF: predicated region fallthrough
CT: control target
= control target key end

     0   :  { %10 = vsyncpa [#allocation3], 0  ;;  %s1274_s0 = inlined_call_operand.hbm [shape: f32[16,128], index: 0, kind: input, shape index: {}]   ;;  %s1275_s1 = inlined_call_operand.hbm [shape: bf16[128,512], index: 1, kind: input, shape index: {}]   ;;  %s1276_s2 = inlined_call_operand.vmem [shape: f32[1,512], index: 2, kind: input, shape index: {}]   ;;  %s1277_s3 = inlined_call_operand.hbm [shape: bf16[512,128], index: 3, kind: input, shape index: {}]   ;;  %s1278_s4 = inlined_call_operand.vmem [shape: f32[1,128], index: 4, kind: input, shape index: {}]   ;;  %s1279_s5 = inlined_call_operand.hbm [shape: f32[16,128], index: 5, kind: output, shape index: {}]  }
   0x1   :  { %11 = vsyncpa [#allocation6], 0 }
   0x2   :  { %12 = vsyncpa [#allocation4], 0  ;;  %s1117_s18 = smov [#allocation5]   ;;  %s1023_s22 = scalar_lea.hbm %s1275_s1, 4096 }
   0x3   :  { %s30_s19 = sshll.u32 %s1117_s18, 4  ;;  %p1024_p0 = scmp.ne.s32.totalorder %s1275_s1, %s1023_s22  ;;  %s31_s19 = int_to_ptr.vmem [resolvable:$true] %s30_s19 }
   0x4   :  { %p1027_p1 = scmp.lt.u32.totalorder %s1023_s22, %s1275_s1 }
   0x6   :  { %p1029_p2 = pnand %p1027_p1, %p1024_p0 }
   0x8   :  { %1032 = shalt.err (!%p1029_p2)
}
   0x9   :  { %s1033_s27 = scalar_lea.vmem %s31_s19, 4096  ;;  %p1038_p4 = scmp.lt.s32.totalorder %s31_s19, %s31_s19 }
   0xa   :  { %p1034_p3 = scmp.ne.s32.totalorder %s31_s19, %s1033_s27  ;;  %p1039_p5 = scmp.lt.s32.totalorder %s1033_s27, %s1033_s27 }
   0xc   :  { %p1040_p6 = por %p1039_p5, %p1038_p4 }
   0xe   :  { %p1041_p7 = pnand %p1040_p6, %p1034_p3 }
  0x10   :  { %1044 = shalt.err (!%p1041_p7)
}
  0x11   :  { %s1118_s28 = smov 256   ;;  %s1119_s29 = smov 16  }
  0x12   :  { %36 = dma.hbm_to_vmem [thread:$0]  %s1275_s1, 4096, %s31_s19, [#allocation6], %s1118_s28, %s1118_s28, %s1119_s29  }
  0x13   :  { %s1120_s7 = smov [#allocation2]   ;;  %s1045_s11 = scalar_lea.hbm %s1274_s0, 256 }
  0x14   :  { %s18_s8 = sshll.u32 %s1120_s7, 4  ;;  %p1046_p8 = scmp.ne.s32.totalorder %s1274_s0, %s1045_s11  ;;  %s19_s8 = int_to_ptr.vmem [resolvable:$true] %s18_s8 }
  0x15   :  { %p1049_p9 = scmp.lt.u32.totalorder %s1045_s11, %s1274_s0 }
  0x17   :  { %p1051_p10 = pnand %p1049_p9, %p1046_p8 }
  0x19   :  { %1054 = shalt.err (!%p1051_p10)
}
  0x1a   :  { %s1055_s16 = scalar_lea.vmem %s19_s8, 256  ;;  %p1060_p12 = scmp.lt.s32.totalorder %s19_s8, %s19_s8 }
  0x1b   :  { %p1056_p11 = scmp.ne.s32.totalorder %s19_s8, %s1055_s16  ;;  %p1061_p13 = scmp.lt.s32.totalorder %s1055_s16, %s1055_s16 }
  0x1d   :  { %p1062_p0 = por %p1061_p13, %p1060_p12 }
  0x1f   :  { %p1063_p1 = pnand %p1062_p0, %p1056_p11 }
  0x21   :  { %1066 = shalt.err (!%p1063_p1)
}
  0x22   :  { %s1121_s1 = smov 128   ;;  %s1122_s17 = smov 8  }
  0x23   :  { %24 = dma.hbm_to_vmem [thread:$0]  %s1274_s0, 256, %s19_s8, [#allocation3], %s1121_s1, %s1121_s1, %s1122_s17  }
  0x24   :  { %s1123_s20 = smov [#allocation7]   ;;  %s1067_s24 = scalar_lea.hbm %s1277_s3, 4096 }
  0x25   :  { %s44_s21 = sshll.u32 %s1123_s20, 4  ;;  %p1068_p2 = scmp.ne.s32.totalorder %s1277_s3, %s1067_s24  ;;  %s45_s21 = int_to_ptr.vmem [resolvable:$true] %s44_s21 }
  0x26   :  { %p1071_p3 = scmp.lt.u32.totalorder %s1067_s24, %s1277_s3 }
  0x28   :  { %p1073_p4 = pnand %p1071_p3, %p1068_p2 }
  0x2a   :  { %1076 = shalt.err (!%p1073_p4)
}
  0x2b   :  { %s1077_s29 = scalar_lea.vmem %s45_s21, 4096  ;;  %p1082_p6 = scmp.lt.s32.totalorder %s45_s21, %s45_s21 }
  0x2c   :  { %p1078_p5 = scmp.ne.s32.totalorder %s45_s21, %s1077_s29  ;;  %p1083_p7 = scmp.lt.s32.totalorder %s1077_s29, %s1077_s29 }
  0x2e   :  { %p1084_p8 = por %p1083_p7, %p1082_p6 }
  0x30   :  { %p1085_p9 = pnand %p1084_p8, %p1078_p5 }
  0x32   :  { %1088 = shalt.err (!%p1085_p9)
}
  0x33   :  { %s1124_s0 = smov 64   ;;  %s1125_s30 = smov 4  }
  0x34   :  { %50 = dma.hbm_to_vmem [thread:$0]  %s1277_s3, 4096, %s45_s21, [#allocation6], %s1124_s0, %s1124_s0, %s1125_s30  }
  0x35   :  { %1111 = dma.done.wait [#allocation3], 256  }
  0x36   :  { %1112 = vsyncadd [#allocation3], 4294967040 }
  0x37   :  { %1113 = dma.done.wait [#allocation6], 8192  }
  0x38   :  { %1114 = vsyncadd [#allocation6], 4294959104  ;;  %v1126_v0 = vmov 0   ;;  %v927_v1 = vld [vmem:[#allocation5 + $0x4] ss:$16 sps:$4 sm:$0xff]   ;;  %v64_v34 = vld [vmem:[#allocation2 + $0x8] sm:$0xff] }
  0x39   :  { %312 = vmatprep.mubr.bf16.mxu0 %v1126_v0  ;;  %355 = vmatprep.mubr.bf16.mxu1 %v1126_v0  ;;  %v929_v2 = vld [vmem:[#allocation5 + $0xc] ss:$16 sps:$4 sm:$0xff]   ;;  %v931_v3 = vld [vmem:[#allocation5] ss:$16 sps:$4 sm:$0xff]   ;;  %v932_v4 = vld [vmem:[#allocation5 + $0x8] ss:$16 sps:$4 sm:$0xff]  }
  0x3a   :  { %280 = vmatprep.subr.bf16.mxu0 %v927_v1  ;;  %323 = vmatprep.subr.bf16.mxu1 %v929_v2  ;;  %v933_v5 = vld [vmem:[#allocation5 + $0x24] ss:$16 sps:$4 sm:$0xff]   ;;  %v935_v6 = vld [vmem:[#allocation5 + $0x2c] ss:$16 sps:$4 sm:$0xff]   ;;  %v937_v7 = vld [vmem:[#allocation5 + $0x20] ss:$16 sps:$4 sm:$0xff]  }
  0x3b   :  { %281 = vmatpush1.bf16.msra.mxu0 %v931_v3  ;;  %324 = vmatpush1.bf16.msra.mxu1 %v932_v4  ;;  %v938_v8 = vld [vmem:[#allocation5 + $0x28] ss:$16 sps:$4 sm:$0xff]   ;;  %v939_v9 = vld [vmem:[#allocation5 + $0x44] ss:$16 sps:$4 sm:$0xff]   ;;  %v941_v10 = vld [vmem:[#allocation5 + $0x4c] ss:$16 sps:$4 sm:$0xff]   ;;  %v100_v4 = vlaneseq }
  0x3c   :  { %282 = vmatprep.subr.bf16.mxu0 %v933_v5  ;;  %325 = vmatprep.subr.bf16.mxu1 %v935_v6  ;;  %v943_v11 = vld [vmem:[#allocation5 + $0x40] ss:$16 sps:$4 sm:$0xff]   ;;  %v944_v12 = vld [vmem:[#allocation5 + $0x48] ss:$16 sps:$4 sm:$0xff]   ;;  %v945_v13 = vld [vmem:[#allocation5 + $0x64] ss:$16 sps:$4 sm:$0xff]  }
  0x3d   :  { %v947_v14 = vld [vmem:[#allocation5 + $0x6c] ss:$16 sps:$4 sm:$0xff]   ;;  %v949_v15 = vld [vmem:[#allocation5 + $0x60] ss:$16 sps:$4 sm:$0xff]   ;;  %v950_v16 = vld [vmem:[#allocation5 + $0x68] ss:$16 sps:$4 sm:$0xff]  }
  0x3e   :  { %v951_v17 = vld [vmem:[#allocation5 + $0x84] ss:$16 sps:$4 sm:$0xff]   ;;  %v953_v18 = vld [vmem:[#allocation5 + $0x8c] ss:$16 sps:$4 sm:$0xff]   ;;  %v955_v19 = vld [vmem:[#allocation5 + $0x80] ss:$16 sps:$4 sm:$0xff]  }
  0x3f   :  { %283 = vmatpush1.bf16.msra.mxu0 %v937_v7  ;;  %326 = vmatpush1.bf16.msra.mxu1 %v938_v8  ;;  %v956_v20 = vld [vmem:[#allocation5 + $0x88] ss:$16 sps:$4 sm:$0xff]   ;;  %v957_v21 = vld [vmem:[#allocation5 + $0xa4] ss:$16 sps:$4 sm:$0xff]   ;;  %v959_v22 = vld [vmem:[#allocation5 + $0xac] ss:$16 sps:$4 sm:$0xff]  }
  0x40   :  { %284 = vmatprep.subr.bf16.mxu0 %v939_v9  ;;  %327 = vmatprep.subr.bf16.mxu1 %v941_v10  ;;  %v961_v23 = vld [vmem:[#allocation5 + $0xa0] ss:$16 sps:$4 sm:$0xff]   ;;  %v962_v24 = vld [vmem:[#allocation5 + $0xa8] ss:$16 sps:$4 sm:$0xff]   ;;  %v963_v25 = vld [vmem:[#allocation5 + $0xc4] ss:$16 sps:$4 sm:$0xff]  }
  0x41   :  { %v965_v26 = vld [vmem:[#allocation5 + $0xcc] ss:$16 sps:$4 sm:$0xff]   ;;  %v967_v27 = vld [vmem:[#allocation5 + $0xc0] ss:$16 sps:$4 sm:$0xff]   ;;  %v968_v28 = vld [vmem:[#allocation5 + $0xc8] ss:$16 sps:$4 sm:$0xff]  }
  0x42   :  { %v969_v29 = vld [vmem:[#allocation5 + $0xe4] ss:$16 sps:$4 sm:$0xff]   ;;  %v971_v30 = vld [vmem:[#allocation5 + $0xec] ss:$16 sps:$4 sm:$0xff]   ;;  %v973_v31 = vld [vmem:[#allocation5 + $0xe0] ss:$16 sps:$4 sm:$0xff]  }
  0x43   :  { %285 = vmatpush1.bf16.msra.mxu0 %v943_v11  ;;  %328 = vmatpush1.bf16.msra.mxu1 %v944_v12  ;;  %v974_v32 = vld [vmem:[#allocation5 + $0xe8] ss:$16 sps:$4 sm:$0xff]   ;;  %v63_v33 = vld [vmem:[#allocation2] sm:$0xff]  ;;  %v975_v36 = vld [vmem:[#allocation7 + $0x40] sm:$0xff]   ;;  %v101_v5 = vshrl.u32 %v100_v4, 7  ;;  %s1127_s10 = smov [#allocation8]  }
  0x44   :  { %286 = vmatprep.subr.bf16.mxu0 %v945_v13  ;;  %329 = vmatprep.subr.bf16.mxu1 %v947_v14  ;;  %v65_v35 = vpack.c.bf16 %v64_v34, %v63_v33  ;;  %v976_v37 = vld [vmem:[#allocation7 + $0xc0] sm:$0xff]   ;;  %v979_v40 = vld [vmem:[#allocation7 + $0x48] sm:$0xff]   ;;  %v983_v44 = vld [vmem:[#allocation7 + $0x50] sm:$0xff]   ;;  %s794_s11 = sshll.u32 %s1127_s10, 4  ;;  %s795_s11 = int_to_ptr.vmem [resolvable:$true] %s794_s11 }
  0x45   :  { %v977_v38 = vld [vmem:[#allocation7] sm:$0xff]   ;;  %v980_v41 = vld [vmem:[#allocation7 + $0xc8] sm:$0xff]   ;;  %v984_v45 = vld [vmem:[#allocation7 + $0xd0] sm:$0xff]   ;;  %v102_v6 = vsub.s32 0, %v101_v5  ;;  %v110_v7 = vsub.s32 2, %v101_v5  ;;  %v106_v9 = vsub.s32 1, %v101_v5  ;;  %p1094_p11 = scmp.lt.s32.totalorder %s795_s11, %s795_s11 }
  0x46   :  { %v978_v39 = vld [vmem:[#allocation7 + $0x80] sm:$0xff]   ;;  %v981_v42 = vld [vmem:[#allocation7 + $0x8] sm:$0xff]   ;;  %v985_v46 = vld [vmem:[#allocation7 + $0x10] sm:$0xff]   ;;  %v114_v10 = vsub.s32 3, %v101_v5 }
  0x47   :  { %287 = vmatpush1.bf16.msra.mxu0 %v949_v15  ;;  %330 = vmatpush1.bf16.msra.mxu1 %v950_v16  ;;  %v982_v43 = vld [vmem:[#allocation7 + $0x88] sm:$0xff]   ;;  %v986_v47 = vld [vmem:[#allocation7 + $0x90] sm:$0xff]   ;;  %v987_v48 = vld [vmem:[#allocation7 + $0x58] sm:$0xff]  }
  0x48   :  { %288 = vmatprep.subr.bf16.mxu0 %v951_v17  ;;  %331 = vmatprep.subr.bf16.mxu1 %v953_v18  ;;  %v988_v49 = vld [vmem:[#allocation7 + $0xd8] sm:$0xff]   ;;  %v991_v52 = vld [vmem:[#allocation7 + $0x60] sm:$0xff]   ;;  %v995_v56 = vld [vmem:[#allocation7 + $0x68] sm:$0xff]  }
  0x49   :  { %v989_v50 = vld [vmem:[#allocation7 + $0x18] sm:$0xff]   ;;  %v992_v53 = vld [vmem:[#allocation7 + $0xe0] sm:$0xff]   ;;  %v996_v57 = vld [vmem:[#allocation7 + $0xe8] sm:$0xff]  }
  0x4a   :  { %v990_v51 = vld [vmem:[#allocation7 + $0x98] sm:$0xff]   ;;  %v993_v54 = vld [vmem:[#allocation7 + $0x20] sm:$0xff]   ;;  %v997_v58 = vld [vmem:[#allocation7 + $0x28] sm:$0xff]  }
  0x4b   :  { %289 = vmatpush1.bf16.msra.mxu0 %v955_v19  ;;  %332 = vmatpush1.bf16.msra.mxu1 %v956_v20  ;;  %v994_v55 = vld [vmem:[#allocation7 + $0xa0] sm:$0xff]   ;;  %v998_v59 = vld [vmem:[#allocation7 + $0xa8] sm:$0xff]   ;;  %v999_v60 = vld [vmem:[#allocation7 + $0x70] sm:$0xff]  }
  0x4c   :  { %290 = vmatprep.subr.bf16.mxu0 %v957_v21  ;;  %333 = vmatprep.subr.bf16.mxu1 %v959_v22  ;;  %v1000_v61 = vld [vmem:[#allocation7 + $0xf0] sm:$0xff]   ;;  %v1003_v0 = vld [vmem:[#allocation7 + $0x78] sm:$0xff]  }
  0x4d   :  { %v1001_v62 = vld [vmem:[#allocation7 + $0x30] sm:$0xff]   ;;  %v1004_v1 = vld [vmem:[#allocation7 + $0xf8] sm:$0xff]  }
  0x4e   :  { %v1002_v63 = vld [vmem:[#allocation7 + $0xb0] sm:$0xff]   ;;  %v1005_v2 = vld [vmem:[#allocation7 + $0x38] sm:$0xff]  }
  0x4f   :  { %291 = vmatpush1.bf16.msra.mxu0 %v961_v23  ;;  %334 = vmatpush1.bf16.msra.mxu1 %v962_v24  ;;  %v1006_v3 = vld [vmem:[#allocation7 + $0xb8] sm:$0xff]   ;;  %v98_v8 = vld [vmem:[%s1276_s2] sm:$0xf] }
  0x50   :  { %292 = vmatprep.subr.bf16.mxu0 %v963_v25  ;;  %335 = vmatprep.subr.bf16.mxu1 %v965_v26  ;;  %v103_v11 = vrot.slane %v98_v8, %v102_v6  ;;  %v111_v12 = vrot.slane %v98_v8, %v110_v7  ;;  %v107_v13 = vrot.slane %v98_v8, %v106_v9 }
  0x51   :  { %v115_v14 = vrot.slane %v98_v8, %v114_v10 }
  0x53   :  { %293 = vmatpush1.bf16.msra.mxu0 %v967_v27  ;;  %336 = vmatpush1.bf16.msra.mxu1 %v968_v28 }
  0x54   :  { %294 = vmatprep.subr.bf16.mxu0 %v969_v29  ;;  %337 = vmatprep.subr.bf16.mxu1 %v971_v30 }
  0x57   :  { %295 = vmatpush1.bf16.msra.mxu0 %v973_v31  ;;  %338 = vmatpush1.bf16.msra.mxu1 %v974_v32 }
  0x58   :  { %872 = vmatprep.subr.bf16.mxu0 %v975_v36  ;;  %894 = vmatprep.subr.bf16.mxu1 %v976_v37 }
  0x5a   :  { %313 = vmatmul.mubr.bf16.vlgmr.msra.gmra.mrb[0].mxu0 %v65_v35  ;;  %356 = vmatmul.mubr.bf16.vlgmr.msra.gmra.mrb[0].mxu1 %v65_v35 }
  0x5b   :  { %873 = vmatpush3.bf16.msra.mxu0 %v977_v38  ;;  %895 = vmatpush3.bf16.msra.mxu1 %v978_v39 }
  0x5c   :  { %874 = vmatprep.subr.bf16.mxu0 %v979_v40  ;;  %896 = vmatprep.subr.bf16.mxu1 %v980_v41 }
  0x5f   :  { %875 = vmatpush3.bf16.msra.mxu0 %v981_v42  ;;  %897 = vmatpush3.bf16.msra.mxu1 %v982_v43 }
  0x60   :  { %876 = vmatprep.subr.bf16.mxu0 %v983_v44  ;;  %898 = vmatprep.subr.bf16.mxu1 %v984_v45 }
  0x63   :  { %877 = vmatpush3.bf16.msra.mxu0 %v985_v46  ;;  %899 = vmatpush3.bf16.msra.mxu1 %v986_v47 }
  0x64   :  { %878 = vmatprep.subr.bf16.mxu0 %v987_v48  ;;  %900 = vmatprep.subr.bf16.mxu1 %v988_v49 }
  0x67   :  { %879 = vmatpush3.bf16.msra.mxu0 %v989_v50  ;;  %901 = vmatpush3.bf16.msra.mxu1 %v990_v51 }
  0x68   :  { %880 = vmatprep.subr.bf16.mxu0 %v991_v52  ;;  %902 = vmatprep.subr.bf16.mxu1 %v992_v53 }
  0x6b   :  { %881 = vmatpush3.bf16.msra.mxu0 %v993_v54  ;;  %903 = vmatpush3.bf16.msra.mxu1 %v994_v55 }
  0x6c   :  { %882 = vmatprep.subr.bf16.mxu0 %v995_v56  ;;  %904 = vmatprep.subr.bf16.mxu1 %v996_v57 }
  0x6f   :  { %883 = vmatpush3.bf16.msra.mxu0 %v997_v58  ;;  %905 = vmatpush3.bf16.msra.mxu1 %v998_v59 }
  0x70   :  { %884 = vmatprep.subr.bf16.mxu0 %v999_v60  ;;  %906 = vmatprep.subr.bf16.mxu1 %v1000_v61 }
  0x73   :  { %885 = vmatpush3.bf16.msra.mxu0 %v1001_v62  ;;  %907 = vmatpush3.bf16.msra.mxu1 %v1002_v63 }
  0x74   :  { %886 = vmatprep.subr.bf16.mxu0 %v1003_v0  ;;  %908 = vmatprep.subr.bf16.mxu1 %v1004_v1 }
  0x77   :  { %887 = vmatpush3.bf16.msra.mxu0 %v1005_v2  ;;  %909 = vmatpush3.bf16.msra.mxu1 %v1006_v3 }
 0x12d   :  { %v314_v15 = vpop.f32.mrb[0].mxu0  ;;  %v357_v16 = vpop.f32.mrb[0].mxu1 }
 0x12e   :  { %v1200_v17 = vadd.f32 %v314_v15, %v103_v11  ;;  %v1202_v18 = vadd.f32 %v357_v16, %v111_v12  ;;  %v316_v19 = vpop.f32.mrb[1].mxu0  ;;  %v359_v20 = vpop.f32.mrb[1].mxu1 }
 0x12f   :  { %v1204_v21 = vadd.f32 %v316_v19, %v107_v13  ;;  %v1206_v22 = vadd.f32 %v359_v20, %v115_v14  ;;  %v318_v23 = vpop.f32.mrb[2].mxu0  ;;  %v361_v24 = vpop.f32.mrb[2].mxu1 }
 0x130   :  { %v366_v25 = vmul.f32 %v1200_v17, %v1200_v17  ;;  %v368_v26 = vmul.f32 %v1202_v18, %v1202_v18  ;;  %v1212_v27 = vadd.f32 %v318_v23, %v103_v11  ;;  %v1214_v28 = vadd.f32 %v361_v24, %v111_v12  ;;  %v320_v29 = vpop.f32.mrb[3].mxu0  ;;  %v363_v30 = vpop.f32.mrb[3].mxu1 }
 0x131   :  { %v367_v31 = vmul.f32 %v1204_v21, %v1204_v21  ;;  %v369_v32 = vmul.f32 %v1206_v22, %v1206_v22  ;;  %v1220_v33 = vadd.f32 %v320_v29, %v107_v13  ;;  %v1222_v34 = vadd.f32 %v363_v30, %v115_v14 }
 0x132   :  { %v374_v35 = vmul.f32 %v366_v25, %v1200_v17  ;;  %v376_v36 = vmul.f32 %v368_v26, %v1202_v18  ;;  %v370_v37 = vmul.f32 %v1212_v27, %v1212_v27  ;;  %v372_v38 = vmul.f32 %v1214_v28, %v1214_v28 }
 0x133   :  { %v375_v39 = vmul.f32 %v367_v31, %v1204_v21  ;;  %v377_v40 = vmul.f32 %v369_v32, %v1206_v22  ;;  %v371_v41 = vmul.f32 %v1220_v33, %v1220_v33  ;;  %v373_v42 = vmul.f32 %v1222_v34, %v1222_v34 }
 0x134   :  { %v382_v43 = vmul.f32 0.044715, %v374_v35  ;;  %v384_v44 = vmul.f32 0.044715, %v376_v36  ;;  %v378_v45 = vmul.f32 %v370_v37, %v1212_v27  ;;  %v380_v46 = vmul.f32 %v372_v38, %v1214_v28 }
 0x135   :  { %v383_v47 = vmul.f32 0.044715, %v375_v39  ;;  %v385_v48 = vmul.f32 0.044715, %v377_v40  ;;  %v379_v49 = vmul.f32 %v371_v41, %v1220_v33  ;;  %v381_v50 = vmul.f32 %v373_v42, %v1222_v34 }
 0x136   :  { %v390_v51 = vadd.f32 %v382_v43, %v1200_v17  ;;  %v392_v52 = vadd.f32 %v384_v44, %v1202_v18  ;;  %v386_v53 = vmul.f32 0.044715, %v378_v45  ;;  %v388_v54 = vmul.f32 0.044715, %v380_v46 }
 0x137   :  { %v391_v55 = vadd.f32 %v383_v47, %v1204_v21  ;;  %v393_v56 = vadd.f32 %v385_v48, %v1206_v22  ;;  %v387_v57 = vmul.f32 0.044715, %v379_v49  ;;  %v389_v58 = vmul.f32 0.044715, %v381_v50 }
 0x138   :  { %v398_v59 = vmul.f32 0.7978846, %v390_v51  ;;  %v400_v60 = vmul.f32 0.7978846, %v392_v52  ;;  %v394_v61 = vadd.f32 %v386_v53, %v1212_v27  ;;  %v396_v62 = vadd.f32 %v388_v54, %v1214_v28 }
 0x139   :  { %v399_v63 = vmul.f32 0.7978846, %v391_v55  ;;  %v401_v0 = vmul.f32 0.7978846, %v393_v56  ;;  %v395_v1 = vadd.f32 %v387_v57, %v1220_v33  ;;  %v397_v2 = vadd.f32 %v389_v58, %v1222_v34 }
 0x13a   :  { %1007 = vtanh.f32 %v398_v59  ;;  %v402_v3 = vmul.f32 0.7978846, %v394_v61  ;;  %v404_v4 = vmul.f32 0.7978846, %v396_v62 }
 0x13b   :  { %1009 = vtanh.f32 %v400_v60  ;;  %v403_v5 = vmul.f32 0.7978846, %v395_v1  ;;  %v405_v6 = vmul.f32 0.7978846, %v397_v2 }
 0x13c   :  { %1011 = vtanh.f32 %v399_v63 }
 0x13d   :  { %1013 = vtanh.f32 %v401_v0 }
 0x13e   :  { %1015 = vtanh.f32 %v402_v3 }
 0x13f   :  { %1017 = vtanh.f32 %v404_v4 }
 0x140   :  { %1019 = vtanh.f32 %v403_v5 }
 0x141   :  { %1021 = vtanh.f32 %v405_v6 }
 0x144   :  { %v1008_v7 = vpop.eup %1007 }
 0x145   :  { %v1010_v8 = vpop.eup %1009  ;;  %v414_v9 = vadd.f32 1.0, %v1008_v7 }
 0x146   :  { %v1012_v10 = vpop.eup %1011  ;;  %v416_v11 = vadd.f32 1.0, %v1010_v8 }
 0x147   :  { %v1014_v12 = vpop.eup %1013  ;;  %v415_v13 = vadd.f32 1.0, %v1012_v10  ;;  %v422_v19 = vmul.f32 0.5, %v414_v9 }
 0x148   :  { %v1016_v14 = vpop.eup %1015  ;;  %v417_v15 = vadd.f32 1.0, %v1014_v12  ;;  %v424_v24 = vmul.f32 0.5, %v416_v11 }
 0x149   :  { %v1018_v16 = vpop.eup %1017  ;;  %v418_v20 = vadd.f32 1.0, %v1016_v14  ;;  %v423_v31 = vmul.f32 0.5, %v415_v13  ;;  %v430_v37 = vmul.f32 %v422_v19, %v1200_v17 }
 0x14a   :  { %v1020_v23 = vpop.eup %1019  ;;  %v420_v25 = vadd.f32 1.0, %v1018_v16  ;;  %v425_v36 = vmul.f32 0.5, %v417_v15  ;;  %v432_v40 = vmul.f32 %v424_v24, %v1202_v18 }
 0x14b   :  { %v1022_v26 = vpop.eup %1021  ;;  %v426_v29 = vmul.f32 0.5, %v418_v20  ;;  %v419_v30 = vadd.f32 1.0, %v1020_v23  ;;  %v431_v43 = vmul.f32 %v423_v31, %v1204_v21  ;;  %v839_v21 = vld [vmem:[%s1278_s4] ss:$0 sm:$0xff]  ;;  %s1089_s4 = scalar_lea.vmem %s795_s11, 256 }
 0x14c   :  { %v428_v32 = vmul.f32 0.5, %v420_v25  ;;  %v421_v35 = vadd.f32 1.0, %v1022_v26  ;;  %v433_v46 = vmul.f32 %v425_v36, %v1206_v22  ;;  %p1090_p10 = scmp.ne.s32.totalorder %s795_s11, %s1089_s4  ;;  %p1095_p12 = scmp.lt.s32.totalorder %s1089_s4, %s1089_s4 }
 0x14d   :  { %v434_v38 = vmul.f32 %v426_v29, %v1212_v27  ;;  %v427_v39 = vmul.f32 0.5, %v419_v30 }
 0x14e   :  { %v436_v41 = vmul.f32 %v428_v32, %v1214_v28  ;;  %v429_v42 = vmul.f32 0.5, %v421_v35  ;;  %p1096_p13 = por %p1095_p12, %p1094_p11 }
 0x14f   :  { %v435_v44 = vmul.f32 %v427_v39, %v1220_v33  ;;  %v438_v45 = vpack.c.bf16 %v434_v38, %v430_v37 }
 0x150   :  { %v437_v47 = vmul.f32 %v429_v42, %v1222_v34  ;;  %v440_v48 = vpack.c.bf16 %v436_v41, %v432_v40  ;;  %p1097_p0 = pnand %p1096_p13, %p1090_p10 }
 0x151   :  { %v439_v49 = vpack.c.bf16 %v435_v44, %v431_v43 }
 0x152   :  { %v441_v17 = vpack.c.bf16 %v437_v47, %v433_v46 }
 0x153   :  { %737 = vmatprep.mubr.bf16.mxu0 %v439_v49 }
 0x154   :  { %778 = vmatprep.mubr.bf16.mxu1 %v441_v17  ;;  %738 = vmatmul.mubr.bf16.vlgmr.msra.gmra.mrb[4].mxu0 %v438_v45 }
 0x155   :  { %779 = vmatmul.mubr.bf16.vlgmr.msra.gmra.mrb[4].mxu1 %v440_v48 }
 0x227   :  { %v888_v18 = vpop.f32.mrb[4].mxu0 }
 0x228   :  { %v910_v27 = vpop.f32.mrb[4].mxu1  ;;  %v889_v28 = vpop.f32.mrb[5].mxu0 }
 0x229   :  { %v890_v33 = vadd.f32 %v889_v28, %v888_v18  ;;  %v911_v50 = vpop.f32.mrb[5].mxu1  ;;  %v891_v51 = vpop.f32.mrb[6].mxu0 }
 0x22a   :  { %v912_v22 = vadd.f32 %v911_v50, %v910_v27  ;;  %v913_v52 = vpop.f32.mrb[6].mxu1  ;;  %v892_v34 = vpop.f32.mrb[7].mxu0 }
 0x22b   :  { %v740_v53 = vadd.f32 %v890_v33, %v839_v21  ;;  %v893_v54 = vadd.f32 %v892_v34, %v891_v51  ;;  %v914_v55 = vpop.f32.mrb[7].mxu1 }
 0x22c   :  { %v915_v56 = vadd.f32 %v914_v55, %v913_v52 }
 0x22d   :  { %v781_v57 = vadd.f32 %v912_v22, %v740_v53  ;;  %v743_v58 = vadd.f32 %v893_v54, %v839_v21 }
 0x22f   :  { %787 = vst [vmem:[#allocation8] sm:$0xff] %v781_v57  ;;  %v784_v59 = vadd.f32 %v915_v56, %v743_v58 }
 0x231   :  { %788 = vst [vmem:[#allocation8 + $0x8] sm:$0xff] %v784_v59 }
 0x232   :  { %1100 = shalt.err (!%p1097_p0)
}
 0x233   :  { %s1101_s14 = scalar_lea.hbm %s1279_s5, 256 }
 0x234   :  { %p1102_p1 = scmp.ne.s32.totalorder %s1279_s5, %s1101_s14  ;;  %p1105_p2 = scmp.lt.u32.totalorder %s1101_s14, %s1279_s5 }
 0x236   :  { %p1107_p3 = pnand %p1105_p2, %p1102_p1 }
 0x238   :  { %1110 = shalt.err (!%p1107_p3)
}
 0x239   :  { %800 = dma.vmem_to_hbm [thread:$0]  %s795_s11, 256, %s1279_s5, [#allocation4], %s1121_s1, %s1121_s1, %s1122_s17  }
 0x23a   :  { %1115 = dma.done.wait [#allocation4], 256  }
 0x23b   :  { %1116 = vsyncadd [#allocation4], 4294967040 }
 0x23c   :  { %804 = vsyncpa [#allocation3], 1 }
 0x23d   :  { %805 = vsyncpa [#allocation6], 1 }
 0x23e   :  { %806 = vsyncpa [#allocation4], 1 }

</bundles_post_ra>
